<compile_context>
chip_gen: v7x
topology: tpu7x:2x2x1
jax: 0.10.0
libtpu: 0.0.40
codegen_flags: <defaults>
</compile_context>

<pallas_src>
import numpy as np
import jax
import jax.numpy as jnp
from jax.experimental import pallas as pl
from jax.experimental.pallas import tpu as pltpu

LOG2PI = float(np.log(2.0 * np.pi))


# --------------------------------- kernel ---------------------------------
def vae_kernel(xT_ref, noiseT_ref,
               w_eh_ref, b_eh_ref,        # encoder_hidden          (n_hidden, m1), (n_hidden, 1)
               w_ehead_ref, b_ehead_ref,  # fused enc mu||logvar    (2*m2, n_hidden), (2*m2, 1)
               w_dh_ref, b_dh_ref,        # decoder_hidden          (n_hidden, m2), (n_hidden, 1)
               w_dmu_ref, b_dmu_ref,      # decoder_mu_out          (m1, n_hidden), (m1, 1)
               out_ref):                  # (1, 1) SMEM partial
    xT = xT_ref[...]                      # (m1, tn)  f32 — batch on lanes
    noiseT = noiseT_ref[...]              # (m2, tn)  f32
    m1, tn = xT.shape
    m2 = noiseT.shape[0]

    # ---- encode(x): hidden + fused mu/logvar heads (one MXU pass for both) ----
    h_enc = jnp.maximum(
        jnp.dot(w_eh_ref[...], xT, preferred_element_type=jnp.float32)
        + b_eh_ref[...], 0.0)                                   # (n_hidden, tn)
    heads = (jnp.dot(w_ehead_ref[...], h_enc,
                     preferred_element_type=jnp.float32)
             + b_ehead_ref[...])                                # (2*m2, tn)
    z_mu = heads[:m2, :]                                        # sublane slice (free)
    z_logvar = heads[m2:, :]

    # ---- reparametrize_noise: z = mu + exp(0.5 * logvar) * eps ----
    sigma = jnp.exp(0.5 * z_logvar)       # one lane-dense EUP pass over (m2, tn)
    var = sigma * sigma                   # == exp(z_logvar); VPU mul, no 2nd exp
    z = z_mu + sigma * noiseT             # (m2, tn)

    # ---- decode(z): only the mu head feeds the bound ----
    # TODO(synk): decoder_logvar_out is computed-and-discarded in the torch
    # forward (x_sigma is fixed to ones in vae_lower_bound); omitted here.
    h_dec = jnp.maximum(
        jnp.dot(w_dh_ref[...], z, preferred_element_type=jnp.float32)
        + b_dh_ref[...], 0.0)                                   # (n_hidden, tn)
    x_mu = (jnp.dot(w_dmu_ref[...], h_dec,
                    preferred_element_type=jnp.float32)
            + b_dmu_ref[...])                                   # (m1, tn)

    # ---- vae_lower_bound (exact, use_sampling=False), constants hoisted ----
    #   tile partial = 0.5 * sum(z_logvar - z_mu^2 - exp(z_logvar))
    #                - 0.5 * sum((x - x_mu)^2)
    #                + tn * 0.5 * (m2 - m1 * log(2*pi))
    resid = xT - x_mu
    s_latent = jnp.sum(z_logvar - z_mu * z_mu - var)   # one reduction over (m2, tn)
    s_recon = jnp.sum(resid * resid)                   # one reduction over (m1, tn)
    partial = 0.5 * (s_latent - s_recon) + tn * 0.5 * (m2 - m1 * LOG2PI)
    out_ref[0, 0] = partial


# --------------------------------- wrapper ---------------------------------
def _tensorcores_per_chip():
    """v7x has 2 TensorCores per chip; v5e/v6e have 1 (one big tile is optimal)."""
    try:
        kind = jax.devices()[0].device_kind.lower()
    except Exception:
        return 1
    return 2 if ("v7" in kind or "7x" in kind) else 1


def vae_forward_pallas(x, noise, params, *, block_n=None, num_tiles=None):
    """params: 10-tuple of (w, b) pairs in torch layer order, weights (in, out), biases (1, out)."""
    (w_eh, b_eh, w_emu, b_emu, w_elv, b_elv, w_dh, b_dh, w_dmu, b_dmu) = params
    n, m1 = x.shape
    m2 = noise.shape[1]
    n_hidden = w_eh.shape[1]

    # ---- batch-tile selection (generation aware, VMEM aware) ----
    if block_n is None:
        if num_tiles is None:
            num_tiles = _tensorcores_per_chip()
        block_n = n
        if num_tiles > 1 and n % (num_tiles * 128) == 0:
            block_n = n // num_tiles                    # one tile per TensorCore on v7x
        # Cap giant tiles: keep double-buffered f32 x/noise streams within ~16 MiB.
        row_bytes = 4 * (m1 + m2)
        cap_rows = max(128, (16 << 20) // (2 * row_bytes))
        while block_n > cap_rows and block_n % 256 == 0:
            block_n //= 2
    assert n % block_n == 0, "batch must be divisible by block_n (no row padding)"
    assert block_n == n or block_n % 128 == 0, "lane-dim tiles must be 128-aligned"
    num_tiles = n // block_n

    # ---- feature-major plumbing (layout only; tiny one-time XLA transposes) ----
    xT = x.T                                            # (m1, n)   batch on lanes
    noiseT = noise.T                                    # (m2, n)
    # Fuse encoder mu / logvar heads into a single (2*m2, n_hidden) matmul.
    w_ehead = jnp.concatenate([w_emu, w_elv], axis=1)   # (n_hidden, 2*m2)
    b_ehead = jnp.concatenate([b_emu, b_elv], axis=1)   # (1, 2*m2)
    weight_args = (w_eh.T, b_eh.T,                      # (n_hidden, m1), (n_hidden, 1)
                   w_ehead.T, b_ehead.T,                # (2*m2, n_hidden), (2*m2, 1)
                   w_dh.T, b_dh.T,                      # (n_hidden, m2), (n_hidden, 1)
                   w_dmu.T, b_dmu.T)                    # (m1, n_hidden), (m1, 1)

    def act_spec(height):
        # Full feature axis on sublanes, batch tile on lanes.
        return pl.BlockSpec((height, block_n), lambda i: (0, i))

    def pinned(a):
        # Whole-array block, same block index every step -> stays resident in VMEM.
        return pl.BlockSpec(a.shape, lambda i: (0, 0))

    in_specs = [act_spec(m1), act_spec(m2)] + [pinned(a) for a in weight_args]
    # Scalar partial per tile lands in SMEM (avoids a masked (1,1) VMEM vector store).
    out_specs = pl.BlockSpec((1, 1), lambda i: (i, 0),
                             memory_space=pltpu.MemorySpace.SMEM)

    flops = 2 * n * n_hidden * (2 * m1 + 3 * m2) + 12 * n * (m1 + m2)
    bytes_accessed = int(sum(a.size * a.dtype.itemsize
                             for a in (x, noise) + weight_args) + num_tiles * 4)
    cost = pl.CostEstimate(flops=flops, transcendentals=n * m2,
                           bytes_accessed=bytes_accessed)

    partials = pl.pallas_call(
        vae_kernel,
        out_shape=jax.ShapeDtypeStruct((num_tiles, 1), jnp.float32),
        grid_spec=pltpu.PrefetchScalarGridSpec(
            num_scalar_prefetch=0,
            grid=(num_tiles,),
            in_specs=in_specs,
            out_specs=out_specs,
        ),
        compiler_params=pltpu.CompilerParams(
            dimension_semantics=("parallel",)),
        cost_estimate=cost,
    )(xT, noiseT, *weight_args)

    return jnp.sum(partials)


# ----------------------- parameter setup (deterministic) -----------------------
def init_linear(key, fan_in, fan_out):
    """Mimic torch.nn.Linear default init, deterministic via JAX PRNG."""
    kw, kb = jax.random.split(key)
    bound = 1.0 / np.sqrt(fan_in)
    w = jax.random.uniform(kw, (fan_in, fan_out), jnp.float32, -bound, bound)
    b = jax.random.uniform(kb, (1, fan_out), jnp.float32, -bound, bound)
    return w, b


def make_params(key, m1, m2, n_hidden):
    keys = jax.random.split(key, 5)
    w_eh, b_eh = init_linear(keys[0], m1, n_hidden)        # encoder_hidden
    w_emu, b_emu = init_linear(keys[1], n_hidden, m2)      # encoder_mu_out
    w_elv, b_elv = init_linear(keys[2], n_hidden, m2)      # encoder_logvar_out
    w_dh, b_dh = init_linear(keys[3], m2, n_hidden)        # decoder_hidden
    w_dmu, b_dmu = init_linear(keys[4], n_hidden, m1)      # decoder_mu_out
    return (w_eh, b_eh, w_emu, b_emu, w_elv, b_elv, w_dh, b_dh, w_dmu, b_dmu)


# ----------------------- pure-JAX reference for verification -----------------------
def vae_forward_ref(x, noise, params):
    (w_eh, b_eh, w_emu, b_emu, w_elv, b_elv, w_dh, b_dh, w_dmu, b_dmu) = params
    m1 = x.shape[1]
    h = jnp.maximum(x @ w_eh + b_eh, 0.0)
    z_mu = h @ w_emu + b_emu
    z_logvar = h @ w_elv + b_elv
    z = z_mu + jnp.exp(0.5 * z_logvar) * noise
    h2 = jnp.maximum(z @ w_dh + b_dh, 0.0)
    x_mu = h2 @ w_dmu + b_dmu
    log_post = -0.5 * jnp.sum(z_logvar + 1.0 + LOG2PI, axis=1)
    log_lik = -0.5 * m1 * LOG2PI - 0.5 * jnp.sum((x - x_mu) ** 2, axis=1)
    log_prior = -0.5 * jnp.sum(z_mu ** 2 + jnp.exp(z_logvar) + LOG2PI, axis=1)
    return -jnp.sum(log_post - log_lik - log_prior)


if __name__ == "__main__":
    n, m1, m2, n_hidden = 512, 16, 8, 32

    key = jax.random.PRNGKey(0)
    kx, knoise, kparams = jax.random.split(key, 3)
    x = jax.random.normal(kx, (n, m1), jnp.float32)
    noise = jax.random.normal(knoise, (n, m2), jnp.float32)
    params = make_params(kparams, m1, m2, n_hidden)

    ref = jax.block_until_ready(vae_forward_ref(x, noise, params))

    # Default path: generation-aware tiling (1 tile on v5e/v6e, 2 parallel tiles on v7x).
    out_default = jax.block_until_ready(vae_forward_pallas(x, noise, params))
    assert np.allclose(np.asarray(out_default), np.asarray(ref),
                       rtol=1e-4, atol=1e-2), (out_default, ref)

    # Explicit multi-tile path (exercises the parallel grid + SMEM partial sum).
    out_2tile = jax.block_until_ready(
        vae_forward_pallas(x, noise, params, block_n=256))
    assert np.allclose(np.asarray(out_2tile), np.asarray(ref),
                       rtol=1e-4, atol=1e-2), (out_2tile, ref)

    print("KERNEL_OK")
</pallas_src>

<mosaic_0001>
module attributes {stable_mosaic.version = 11 : i64} {
  func.func @vae_kernel(%arg0: i32, %arg1: memref<16x512xf32, #tpu.memory_space<vmem>>, %arg2: memref<8x512xf32, #tpu.memory_space<vmem>>, %arg3: memref<32x16xf32, #tpu.memory_space<vmem>>, %arg4: memref<32x1xf32, #tpu.memory_space<vmem>>, %arg5: memref<16x32xf32, #tpu.memory_space<vmem>>, %arg6: memref<16x1xf32, #tpu.memory_space<vmem>>, %arg7: memref<32x8xf32, #tpu.memory_space<vmem>>, %arg8: memref<32x1xf32, #tpu.memory_space<vmem>>, %arg9: memref<16x32xf32, #tpu.memory_space<vmem>>, %arg10: memref<16x1xf32, #tpu.memory_space<vmem>>, %arg11: memref<1x1xf32, #tpu.memory_space<smem>>) attributes {dimension_semantics = [#tpu.dimension_semantics<parallel>], iteration_bounds = array<i64: 1>, scalar_prefetch = 0 : i64, scratch_operands = 0 : i64, tpu.core_type = #tpu.core_type<tc>, window_params = [{transform_indices = @transform_0, window_bounds = array<i64: 16, 512>}, {transform_indices = @transform_1, window_bounds = array<i64: 8, 512>}, {pipeline_mode = #tpu.pipeline_mode<synchronous>, transform_indices = @transform_2, window_bounds = array<i64: 32, 16>}, {pipeline_mode = #tpu.pipeline_mode<synchronous>, transform_indices = @transform_3, window_bounds = array<i64: 32, 1>}, {pipeline_mode = #tpu.pipeline_mode<synchronous>, transform_indices = @transform_4, window_bounds = array<i64: 16, 32>}, {pipeline_mode = #tpu.pipeline_mode<synchronous>, transform_indices = @transform_5, window_bounds = array<i64: 16, 1>}, {pipeline_mode = #tpu.pipeline_mode<synchronous>, transform_indices = @transform_6, window_bounds = array<i64: 32, 8>}, {pipeline_mode = #tpu.pipeline_mode<synchronous>, transform_indices = @transform_7, window_bounds = array<i64: 32, 1>}, {pipeline_mode = #tpu.pipeline_mode<synchronous>, transform_indices = @transform_8, window_bounds = array<i64: 16, 32>}, {pipeline_mode = #tpu.pipeline_mode<synchronous>, transform_indices = @transform_9, window_bounds = array<i64: 16, 1>}, {transform_indices = @transform_10, window_bounds = array<i64: 1, 1>}]} {
    %c0 = arith.constant 0 : index
    %c0_0 = arith.constant 0 : index
    %0 = vector.load %arg1[%c0, %c0_0] : memref<16x512xf32, #tpu.memory_space<vmem>>, vector<16x512xf32>
    %c0_1 = arith.constant 0 : index
    %c0_2 = arith.constant 0 : index
    %1 = vector.load %arg2[%c0_1, %c0_2] : memref<8x512xf32, #tpu.memory_space<vmem>>, vector<8x512xf32>
    %c0_3 = arith.constant 0 : index
    %c0_4 = arith.constant 0 : index
    %2 = vector.load %arg3[%c0_3, %c0_4] : memref<32x16xf32, #tpu.memory_space<vmem>>, vector<32x16xf32>
    %cst = arith.constant dense<0.000000e+00> : vector<32x512xf32>
    %3 = tpu.matmul %2, %0, %cst {dimension_numbers = #tpu.dot_dimension_numbers<[1], [0], [0], [1], [0, 0, 1, 1], [], []>} : vector<32x16xf32>, vector<16x512xf32>, vector<32x512xf32> -> vector<32x512xf32>
    %c0_5 = arith.constant 0 : index
    %c0_6 = arith.constant 0 : index
    %4 = vector.load %arg4[%c0_5, %c0_6] : memref<32x1xf32, #tpu.memory_space<vmem>>, vector<32x1xf32>
    %5 = vector.broadcast %4 : vector<32x1xf32> to vector<32x512xf32>
    %6 = arith.addf %3, %5 : vector<32x512xf32>
    %cst_7 = arith.constant 0.000000e+00 : f32
    %7 = vector.broadcast %cst_7 : f32 to vector<32x512xf32>
    %8 = arith.maximumf %6, %7 : vector<32x512xf32>
    %c0_8 = arith.constant 0 : index
    %c0_9 = arith.constant 0 : index
    %9 = vector.load %arg5[%c0_8, %c0_9] : memref<16x32xf32, #tpu.memory_space<vmem>>, vector<16x32xf32>
    %cst_10 = arith.constant dense<0.000000e+00> : vector<16x512xf32>
    %10 = tpu.matmul %9, %8, %cst_10 {dimension_numbers = #tpu.dot_dimension_numbers<[1], [0], [0], [1], [0, 0, 1, 1], [], []>} : vector<16x32xf32>, vector<32x512xf32>, vector<16x512xf32> -> vector<16x512xf32>
    %c0_11 = arith.constant 0 : index
    %c0_12 = arith.constant 0 : index
    %11 = vector.load %arg6[%c0_11, %c0_12] : memref<16x1xf32, #tpu.memory_space<vmem>>, vector<16x1xf32>
    %12 = vector.broadcast %11 : vector<16x1xf32> to vector<16x512xf32>
    %13 = arith.addf %10, %12 : vector<16x512xf32>
    %14 = vector.extract_strided_slice %13 {offsets = [0, 0], sizes = [8, 512], strides = [1, 1]} : vector<16x512xf32> to vector<8x512xf32>
    %15 = vector.extract_strided_slice %13 {offsets = [8, 0], sizes = [8, 512], strides = [1, 1]} : vector<16x512xf32> to vector<8x512xf32>
    %cst_13 = arith.constant 5.000000e-01 : f32
    %16 = vector.broadcast %cst_13 : f32 to vector<8x512xf32>
    %17 = arith.mulf %16, %15 : vector<8x512xf32>
    %18 = math.exp %17 : vector<8x512xf32>
    %19 = arith.mulf %18, %18 : vector<8x512xf32>
    %20 = arith.mulf %18, %1 : vector<8x512xf32>
    %21 = arith.addf %14, %20 : vector<8x512xf32>
    %c0_14 = arith.constant 0 : index
    %c0_15 = arith.constant 0 : index
    %22 = vector.load %arg7[%c0_14, %c0_15] : memref<32x8xf32, #tpu.memory_space<vmem>>, vector<32x8xf32>
    %cst_16 = arith.constant dense<0.000000e+00> : vector<32x512xf32>
    %23 = tpu.matmul %22, %21, %cst_16 {dimension_numbers = #tpu.dot_dimension_numbers<[1], [0], [0], [1], [0, 0, 1, 1], [], []>} : vector<32x8xf32>, vector<8x512xf32>, vector<32x512xf32> -> vector<32x512xf32>
    %c0_17 = arith.constant 0 : index
    %c0_18 = arith.constant 0 : index
    %24 = vector.load %arg8[%c0_17, %c0_18] : memref<32x1xf32, #tpu.memory_space<vmem>>, vector<32x1xf32>
    %25 = vector.broadcast %24 : vector<32x1xf32> to vector<32x512xf32>
    %26 = arith.addf %23, %25 : vector<32x512xf32>
    %cst_19 = arith.constant 0.000000e+00 : f32
    %27 = vector.broadcast %cst_19 : f32 to vector<32x512xf32>
    %28 = arith.maximumf %26, %27 : vector<32x512xf32>
    %c0_20 = arith.constant 0 : index
    %c0_21 = arith.constant 0 : index
    %29 = vector.load %arg9[%c0_20, %c0_21] : memref<16x32xf32, #tpu.memory_space<vmem>>, vector<16x32xf32>
    %cst_22 = arith.constant dense<0.000000e+00> : vector<16x512xf32>
    %30 = tpu.matmul %29, %28, %cst_22 {dimension_numbers = #tpu.dot_dimension_numbers<[1], [0], [0], [1], [0, 0, 1, 1], [], []>} : vector<16x32xf32>, vector<32x512xf32>, vector<16x512xf32> -> vector<16x512xf32>
    %c0_23 = arith.constant 0 : index
    %c0_24 = arith.constant 0 : index
    %31 = vector.load %arg10[%c0_23, %c0_24] : memref<16x1xf32, #tpu.memory_space<vmem>>, vector<16x1xf32>
    %32 = vector.broadcast %31 : vector<16x1xf32> to vector<16x512xf32>
    %33 = arith.addf %30, %32 : vector<16x512xf32>
    %34 = arith.subf %0, %33 : vector<16x512xf32>
    %35 = arith.mulf %14, %14 : vector<8x512xf32>
    %36 = arith.subf %15, %35 : vector<8x512xf32>
    %37 = arith.subf %36, %19 : vector<8x512xf32>
    %38 = vector.shape_cast %37 : vector<8x512xf32> to vector<1x8x512xf32>
    %cst_25 = arith.constant dense<0.000000e+00> : vector<1xf32>
    %39 = vector.multi_reduction <add>, %38, %cst_25 [1, 2] : vector<1x8x512xf32> to vector<1xf32>
    %40 = vector.shape_cast %39 : vector<1xf32> to vector<1x1x1xf32>
    %41 = vector.extract %40[0, 0, 0] : f32 from vector<1x1x1xf32>
    %42 = arith.mulf %34, %34 : vector<16x512xf32>
    %43 = vector.shape_cast %42 : vector<16x512xf32> to vector<1x16x512xf32>
    %cst_26 = arith.constant dense<0.000000e+00> : vector<1xf32>
    %44 = vector.multi_reduction <add>, %43, %cst_26 [1, 2] : vector<1x16x512xf32> to vector<1xf32>
    %45 = vector.shape_cast %44 : vector<1xf32> to vector<1x1x1xf32>
    %46 = vector.extract %45[0, 0, 0] : f32 from vector<1x1x1xf32>
    %47 = arith.subf %41, %46 : f32
    %cst_27 = arith.constant 5.000000e-01 : f32
    %48 = arith.mulf %cst_27, %47 : f32
    %cst_28 = arith.constant -5479.94434 : f32
    %49 = arith.addf %48, %cst_28 : f32
    %c0_29 = arith.constant 0 : index
    %c0_30 = arith.constant 0 : index
    %50 = memref.load %arg11[%c0_29, %c0_30] : memref<1x1xf32, #tpu.memory_space<smem>>
    memref.store %49, %arg11[%c0_29, %c0_30] : memref<1x1xf32, #tpu.memory_space<smem>>
    return
  }
  func.func @transform_0(%arg0: i32) -> (i32, i32) {
    %c0_i32 = arith.constant 0 : i32
    %c0_i32_0 = arith.constant 0 : i32
    return %c0_i32, %arg0 : i32, i32
  }
  func.func @transform_1(%arg0: i32) -> (i32, i32) {
    %c0_i32 = arith.constant 0 : i32
    %c0_i32_0 = arith.constant 0 : i32
    return %c0_i32, %arg0 : i32, i32
  }
  func.func @transform_2(%arg0: i32) -> (i32, i32) {
    %c0_i32 = arith.constant 0 : i32
    %c0_i32_0 = arith.constant 0 : i32
    %c0_i32_1 = arith.constant 0 : i32
    return %c0_i32, %c0_i32_0 : i32, i32
  }
  func.func @transform_3(%arg0: i32) -> (i32, i32) {
    %c0_i32 = arith.constant 0 : i32
    %c0_i32_0 = arith.constant 0 : i32
    %c0_i32_1 = arith.constant 0 : i32
    return %c0_i32, %c0_i32_0 : i32, i32
  }
  func.func @transform_4(%arg0: i32) -> (i32, i32) {
    %c0_i32 = arith.constant 0 : i32
    %c0_i32_0 = arith.constant 0 : i32
    %c0_i32_1 = arith.constant 0 : i32
    return %c0_i32, %c0_i32_0 : i32, i32
  }
  func.func @transform_5(%arg0: i32) -> (i32, i32) {
    %c0_i32 = arith.constant 0 : i32
    %c0_i32_0 = arith.constant 0 : i32
    %c0_i32_1 = arith.constant 0 : i32
    return %c0_i32, %c0_i32_0 : i32, i32
  }
  func.func @transform_6(%arg0: i32) -> (i32, i32) {
    %c0_i32 = arith.constant 0 : i32
    %c0_i32_0 = arith.constant 0 : i32
    %c0_i32_1 = arith.constant 0 : i32
    return %c0_i32, %c0_i32_0 : i32, i32
  }
  func.func @transform_7(%arg0: i32) -> (i32, i32) {
    %c0_i32 = arith.constant 0 : i32
    %c0_i32_0 = arith.constant 0 : i32
    %c0_i32_1 = arith.constant 0 : i32
    return %c0_i32, %c0_i32_0 : i32, i32
  }
  func.func @transform_8(%arg0: i32) -> (i32, i32) {
    %c0_i32 = arith.constant 0 : i32
    %c0_i32_0 = arith.constant 0 : i32
    %c0_i32_1 = arith.constant 0 : i32
    return %c0_i32, %c0_i32_0 : i32, i32
  }
  func.func @transform_9(%arg0: i32) -> (i32, i32) {
    %c0_i32 = arith.constant 0 : i32
    %c0_i32_0 = arith.constant 0 : i32
    %c0_i32_1 = arith.constant 0 : i32
    return %c0_i32, %c0_i32_0 : i32, i32
  }
  func.func @transform_10(%arg0: i32) -> (i32, i32) {
    %c0_i32 = arith.constant 0 : i32
    %c0_i32_0 = arith.constant 0 : i32
    return %arg0, %c0_i32 : i32, i32
  }
}

</mosaic_0001>

<bundles_post_ra>
// kernel: tpu_custom_call.1
= control target key start
LH: loop header
LB: loop body
LE: loop exit
PB: predicated region body
PF: predicated region fallthrough
CT: control target
= control target key end

     0   :  { %v1058_v7 = vmov 0.0   ;;  %v1059_v12 = vmov 0   ;;  %vm76_vm0 = vcmask 130048   ;;  %s1322_s0 = inlined_call_operand.vmem [shape: f32[16,512], index: 0, kind: input, shape index: {}]   ;;  %s1323_s1 = inlined_call_operand.vmem [shape: f32[8,512], index: 1, kind: input, shape index: {}]   ;;  %s1324_s2 = inlined_call_operand.vmem [shape: f32[32,16], index: 2, kind: input, shape index: {}]   ;;  %s1325_s3 = inlined_call_operand.vmem [shape: f32[32,1], index: 3, kind: input, shape index: {}]   ;;  %s1326_s4 = inlined_call_operand.vmem [shape: f32[16,32], index: 4, kind: input, shape index: {}]   ;;  %s1327_s5 = inlined_call_operand.vmem [shape: f32[16,1], index: 5, kind: input, shape index: {}]   ;;  %s1328_s6 = inlined_call_operand.vmem [shape: f32[32,8], index: 6, kind: input, shape index: {}]   ;;  %s1329_s7 = inlined_call_operand.vmem [shape: f32[32,1], index: 7, kind: input, shape index: {}]   ;;  %s1330_s8 = inlined_call_operand.vmem [shape: f32[16,32], index: 8, kind: input, shape index: {}]   ;;  %s1331_s9 = inlined_call_operand.vmem [shape: f32[16,1], index: 9, kind: input, shape index: {}]   ;;  %s1332_s10 = inlined_call_operand.hbm [shape: f32[1,1], index: 10, kind: output, shape index: {}]  }
   0x1   :  { %v1119_v0 = vld [vmem:[%s1322_s0 + $0x8] sm:$0xff]  ;;  %v1129_v2 = vld [vmem:[%s1322_s0 + $0x18] sm:$0xff]  ;;  %v1141_v5 = vld [vmem:[%s1322_s0] sm:$0xff]  ;;  %153 = vmatprep.mubr.f32.mxu0 %v1058_v7  ;;  %242 = vmatprep.mubr.f32.mxu1 %v1058_v7 }
   0x2   :  { %v1124_v1 = vld [vmem:[%s1322_s0 + $0x28] sm:$0xff]  ;;  %v1136_v4 = vld [vmem:[%s1322_s0 + $0x38] sm:$0xff]  ;;  %v1146_v6 = vld [vmem:[%s1322_s0 + $0x20] sm:$0xff]  ;;  %1036 = vset.pattern.permute.xlu0 %v1059_v12  ;;  %1037 = vset.pattern.permute.xlu1 %v1059_v12 }
   0x3   :  { %v989_v3 = vpack.c.bf16 %v1124_v1, %v1119_v0  ;;  %v993_v8 = vpack.c.bf16 %v1136_v4, %v1129_v2  ;;  %v991_v9 = vpack.c.bf16 %v1146_v6, %v1141_v5  ;;  %v1157_v10 = vld [vmem:[%s1322_s0 + $0x10] sm:$0xff]  ;;  %v48_v14 = vld [vmem:[%s1324_s2] sm:$0xff]  ;;  %v53_v17 = vld [vmem:[%s1325_s3 + $0x8] sm:$0xff] }
   0x4   :  { %v1162_v11 = vld [vmem:[%s1322_s0 + $0x30] sm:$0xff]  ;;  %v52_v15 = vld [vmem:[%s1325_s3] sm:$0xff]  ;;  %v55_v18 = vld [vmem:[%s1325_s3 + $0x18] sm:$0xff] }
   0x5   :  { %990 = vmatprep.subr.bf16.mxu0 %v989_v3  ;;  %v995_v13 = vpack.c.bf16 %v1162_v11, %v1157_v10  ;;  %994 = vmatprep.subr.bf16.mxu1 %v993_v8  ;;  %v54_v16 = vld [vmem:[%s1325_s3 + $0x10] sm:$0xff]  ;;  %v49_v19 = vld [vmem:[%s1324_s2 + $0x8] sm:$0xff] }
   0x6   :  { %992 = vmatpush1.bf16.msra.mxu0 %v991_v9  ;;  %58 = vperm.xlu0 %1036, %v52_v15  }
   0x7   :  { %996 = vmatpush1.bf16.msra.mxu1 %v995_v13  ;;  %68 = vperm.xlu1 %1037, %v54_v16  }
   0x9   :  { %965 = vmatmul.mubr.msk.f32.vlgmr.msra.gmra.mrb[0].mxu0 %vm76_vm0, %v48_v14 }
   0xa   :  { %969 = vmatmul.mubr.msk.f32.vlgmr.msra.gmra.mrb[0].mxu1 %vm76_vm0, %v48_v14  ;;  %159 = vmatprep.mubr.f32.mxu0 %v1058_v7 }
   0xb   :  { %15 = vsyncpa [#allocation3], 0  ;;  %248 = vmatprep.mubr.f32.mxu1 %v1058_v7  ;;  %63 = vperm.xlu0 %1036, %v53_v17   ;;  %v286_v20 = vld [vmem:[%s1327_s5 + $0x8] sm:$0xff]  ;;  %v285_v21 = vld [vmem:[%s1327_s5] sm:$0xff]  ;;  %vm297_vm1 = vcmask 261120   ;;  %vm510_vm2 = vcmask 64512  }
   0xc   :  { %73 = vperm.xlu1 %1037, %v55_v18   ;;  %v50_v22 = vld [vmem:[%s1324_s2 + $0x10] sm:$0xff]  ;;  %v486_v23 = vld [vmem:[%s1329_s7] sm:$0xff]  ;;  %v487_v24 = vld [vmem:[%s1329_s7 + $0x8] sm:$0xff] }
   0xd   :  { %966 = vmatmul.mubr.msk.f32.gmra.mrb[2].mxu0 %vm76_vm0, %v49_v19  ;;  %v51_v25 = vld [vmem:[%s1324_s2 + $0x18] sm:$0xff]  ;;  %v488_v26 = vld [vmem:[%s1329_s7 + $0x10] sm:$0xff]  ;;  %v719_v28 = vld [vmem:[%s1331_s9] sm:$0xff] }
   0xe   :  { %970 = vmatmul.mubr.msk.f32.gmra.mrb[2].mxu1 %vm76_vm0, %v49_v19  ;;  %165 = vmatprep.mubr.f32.mxu0 %v1058_v7  ;;  %v489_v27 = vld [vmem:[%s1329_s7 + $0x18] sm:$0xff]  ;;  %v720_v29 = vld [vmem:[%s1331_s9 + $0x8] sm:$0xff]  ;;  %s1046_s9 = scalar_lea.hbm %s1332_s10, 16 }
   0xf   :  { %254 = vmatprep.mubr.f32.mxu1 %v1058_v7  ;;  %294 = vperm.xlu0 %1036, %v286_v20   ;;  %p1047_p0 = scmp.ne.s32.totalorder %s1332_s10, %s1046_s9  ;;  %p1050_p1 = scmp.lt.u32.totalorder %s1046_s9, %s1332_s10 }
  0x10   :  { %289 = vperm.xlu1 %1037, %v285_v21  }
  0x11   :  { %967 = vmatmul.mubr.msk.f32.gmra.mrb[4].mxu0 %vm76_vm0, %v50_v22  ;;  %p1052_p2 = pnand %p1050_p1, %p1047_p0 }
  0x12   :  { %971 = vmatmul.mubr.msk.f32.gmra.mrb[4].mxu1 %vm76_vm0, %v50_v22  ;;  %171 = vmatprep.mubr.f32.mxu0 %v1058_v7 }
  0x13   :  { %260 = vmatprep.mubr.f32.mxu1 %v1058_v7  ;;  %492 = vperm.xlu0 %1036, %v486_v23  }
  0x14   :  { %497 = vperm.xlu1 %1037, %v487_v24  }
  0x15   :  { %968 = vmatmul.mubr.msk.f32.gmra.mrb[6].mxu0 %vm76_vm0, %v51_v25 }
  0x16   :  { %972 = vmatmul.mubr.msk.f32.gmra.mrb[6].mxu1 %vm76_vm0, %v51_v25  ;;  %368 = vmatprep.mubr.f32.mxu0 %v1058_v7 }
  0x17   :  { %502 = vperm.xlu0 %1036, %v488_v26   ;;  %445 = vmatprep.mubr.f32.mxu1 %v1058_v7 }
  0x18   :  { %507 = vperm.xlu1 %1037, %v489_v27  }
  0x1b   :  { %723 = vperm.xlu0 %1036, %v719_v28  }
  0x1c   :  { %728 = vperm.xlu1 %1037, %v720_v29  }
  0x85   :  { %v59_v30 = vpop.permute.xlu0 %58 }
  0x86   :  { %v69_v44 = vpop.permute.xlu1 %68 }
  0x8a   :  { %v64_v37 = vpop.permute.xlu0 %63 }
  0x8b   :  { %v74_v9 = vpop.permute.xlu1 %73 }
  0xdc   :  { %v155_v31 = vpop.f32.mrb[0].mxu0 }
  0xdd   :  { %v157_v32 = vpop.f32.mrb[1].mxu0  ;;  %v244_v33 = vpop.f32.mrb[0].mxu1  ;;  %v156_v36 = vadd.f32 %v155_v31, %v59_v30 }
  0xde   :  { %v245_v34 = vadd.f32 %v244_v33, %v59_v30  ;;  %v246_v35 = vpop.f32.mrb[1].mxu1  ;;  %v158_v38 = vadd.f32 %v157_v32, %v59_v30 }
  0xdf   :  { %v247_v40 = vadd.f32 %v246_v35, %v59_v30  ;;  %v267_v49 = vmax.f32 %v156_v36, 0.0  ;;  %v283_v35 = vld [vmem:[%s1326_s4] sm:$0xff]  ;;  %v284_v36 = vld [vmem:[%s1326_s4 + $0x8] sm:$0xff] }
  0xe0   :  { %v161_v39 = vpop.f32.mrb[2].mxu0  ;;  %v269_v45 = vmax.f32 %v245_v34, 0.0  ;;  %v268_v52 = vmax.f32 %v158_v38, 0.0 }
  0xe1   :  { %v162_v41 = vadd.f32 %v161_v39, %v64_v37  ;;  %v250_v42 = vpop.f32.mrb[2].mxu1  ;;  %v163_v43 = vpop.f32.mrb[3].mxu0  ;;  %v270_v56 = vmax.f32 %v247_v40, 0.0 }
  0xe2   :  { %v251_v46 = vadd.f32 %v250_v42, %v64_v37  ;;  %v164_v47 = vadd.f32 %v163_v43, %v64_v37  ;;  %v252_v48 = vpop.f32.mrb[3].mxu1 }
  0xe3   :  { %v271_v50 = vmax.f32 %v162_v41, 0.0  ;;  %v253_v51 = vadd.f32 %v252_v48, %v64_v37  ;;  %v290_v37 = vpop.permute.xlu1 %289 }
  0xe4   :  { %v273_v53 = vmax.f32 %v251_v46, 0.0  ;;  %v272_v54 = vmax.f32 %v164_v47, 0.0  ;;  %v167_v55 = vpop.f32.mrb[4].mxu0  ;;  %v295_v46 = vpop.permute.xlu0 %294 }
  0xe5   :  { %v999_v57 = vpack.c.bf16 %v271_v50, %v267_v49  ;;  %v274_v58 = vmax.f32 %v253_v51, 0.0  ;;  %v256_v59 = vpop.f32.mrb[4].mxu1  ;;  %v169_v60 = vpop.f32.mrb[5].mxu0  ;;  %v168_v8 = vadd.f32 %v167_v55, %v69_v44 }
  0xe6   :  { %v1007_v61 = vpack.c.bf16 %v273_v53, %v269_v45  ;;  %v997_v62 = vpack.c.bf16 %v272_v54, %v268_v52  ;;  %v258_v63 = vpop.f32.mrb[5].mxu1  ;;  %v257_v12 = vadd.f32 %v256_v59, %v69_v44  ;;  %v170_v13 = vadd.f32 %v169_v60, %v69_v44 }
  0xe7   :  { %v1005_v3 = vpack.c.bf16 %v274_v58, %v270_v56  ;;  %v259_v15 = vadd.f32 %v258_v63, %v69_v44  ;;  %v275_v22 = vmax.f32 %v168_v8, 0.0 }
  0xe8   :  { %v173_v14 = vpop.f32.mrb[6].mxu0  ;;  %998 = vmatprep.subr.bf16.mxu0 %v997_v62  ;;  %v277_v25 = vmax.f32 %v257_v12, 0.0  ;;  %v276_v26 = vmax.f32 %v170_v13, 0.0 }
  0xe9   :  { %v174_v16 = vadd.f32 %v173_v14, %v74_v9  ;;  %v262_v17 = vpop.f32.mrb[6].mxu1  ;;  %1006 = vmatprep.subr.bf16.mxu1 %v1005_v3  ;;  %v175_v18 = vpop.f32.mrb[7].mxu0  ;;  %1000 = vmatpush1.bf16.msra.mxu0 %v999_v57  ;;  %v278_v29 = vmax.f32 %v259_v15, 0.0 }
  0xea   :  { %v263_v19 = vadd.f32 %v262_v17, %v74_v9  ;;  %v176_v20 = vadd.f32 %v175_v18, %v74_v9  ;;  %v264_v21 = vpop.f32.mrb[7].mxu1  ;;  %1008 = vmatpush1.bf16.msra.mxu1 %v1007_v61  ;;  %v46_v17 = vld [vmem:[%s1323_s1 + $0x10] sm:$0xff] }
  0xeb   :  { %v279_v23 = vmax.f32 %v174_v16, 0.0  ;;  %v265_v24 = vadd.f32 %v264_v21, %v74_v9  ;;  %v44_v16 = vld [vmem:[%s1323_s1] sm:$0xff] }
  0xec   :  { %v281_v27 = vmax.f32 %v263_v19, 0.0  ;;  %v280_v28 = vmax.f32 %v176_v20, 0.0  ;;  %v45_v19 = vld [vmem:[%s1323_s1 + $0x8] sm:$0xff] }
  0xed   :  { %v1003_v30 = vpack.c.bf16 %v279_v23, %v275_v22  ;;  %v282_v31 = vmax.f32 %v265_v24, 0.0  ;;  %v47_v22 = vld [vmem:[%s1323_s1 + $0x18] sm:$0xff] }
  0xee   :  { %v1011_v32 = vpack.c.bf16 %v281_v27, %v277_v25  ;;  %v1001_v33 = vpack.c.bf16 %v280_v28, %v276_v26 }
  0xef   :  { %v1009_v34 = vpack.c.bf16 %v282_v31, %v278_v29 }
  0xf0   :  { %1002 = vmatprep.subr.bf16.mxu0 %v1001_v33 }
  0xf1   :  { %1010 = vmatprep.subr.bf16.mxu1 %v1009_v34  ;;  %1004 = vmatpush1.bf16.msra.mxu0 %v1003_v30 }
  0xf2   :  { %1012 = vmatpush1.bf16.msra.mxu1 %v1011_v32 }
  0xf4   :  { %973 = vmatmul.mubr.msk.f32.vlgmr.msra.gmra.mrb[8].mxu0 %vm297_vm1, %v283_v35 }
  0xf5   :  { %975 = vmatmul.mubr.msk.f32.vlgmr.msra.gmra.mrb[8].mxu1 %vm297_vm1, %v283_v35  ;;  %374 = vmatprep.mubr.f32.mxu0 %v1058_v7 }
  0xf6   :  { %451 = vmatprep.mubr.f32.mxu1 %v1058_v7 }
  0xf8   :  { %974 = vmatmul.mubr.msk.f32.gmra.mrb[10].mxu0 %vm297_vm1, %v284_v36 }
  0xf9   :  { %976 = vmatmul.mubr.msk.f32.gmra.mrb[10].mxu1 %vm297_vm1, %v284_v36  ;;  %587 = vmatprep.mubr.f32.mxu0 %v1058_v7 }
  0xfa   :  { %676 = vmatprep.mubr.f32.mxu1 %v1058_v7 }
 0x1c7   :  { %v370_v38 = vpop.f32.mrb[8].mxu0 }
 0x1c8   :  { %v371_v39 = vadd.f32 %v370_v38, %v290_v37  ;;  %v447_v40 = vpop.f32.mrb[8].mxu1  ;;  %v372_v41 = vpop.f32.mrb[9].mxu0 }
 0x1c9   :  { %v448_v42 = vadd.f32 %v447_v40, %v290_v37  ;;  %v373_v43 = vadd.f32 %v372_v41, %v290_v37  ;;  %v449_v44 = vpop.f32.mrb[9].mxu1  ;;  %v482_v40 = vld [vmem:[%s1328_s6] sm:$0xff] }
 0x1ca   :  { %v450_v45 = vadd.f32 %v449_v44, %v290_v37  ;;  %v899_v48 = vmul.f32 %v371_v39, %v371_v39 }
 0x1cb   :  { %v376_v47 = vpop.f32.mrb[10].mxu0  ;;  %v901_v52 = vmul.f32 %v448_v42, %v448_v42  ;;  %v900_v53 = vmul.f32 %v373_v43, %v373_v43 }
 0x1cc   :  { %v377_v49 = vadd.f32 %v376_v47, %v295_v46  ;;  %v453_v50 = vpop.f32.mrb[10].mxu1  ;;  %v378_v51 = vpop.f32.mrb[11].mxu0  ;;  %v902_v57 = vmul.f32 %v450_v45, %v450_v45 }
 0x1cd   :  { %v454_v54 = vadd.f32 %v453_v50, %v295_v46  ;;  %v379_v55 = vadd.f32 %v378_v51, %v295_v46  ;;  %v455_v56 = vpop.f32.mrb[11].mxu1  ;;  %v493_v47 = vpop.permute.xlu0 %492 }
 0x1ce   :  { %v458_v58 = vmul.f32 0.5, %v377_v49  ;;  %v903_v59 = vsub.f32 %v377_v49, %v899_v48  ;;  %v456_v60 = vadd.f32 %v455_v56, %v295_v46  ;;  %v485_v46 = vld [vmem:[%s1328_s6 + $0x18] sm:$0xff] }
 0x1cf   :  { %v460_v61 = vmul.f32 0.5, %v454_v54  ;;  %v905_v62 = vsub.f32 %v454_v54, %v901_v52  ;;  %v459_v63 = vmul.f32 0.5, %v379_v55  ;;  %v904_v3 = vsub.f32 %v379_v55, %v900_v53 }
 0x1d0   :  { %v462_v8 = vmul.f32 1.442695, %v458_v58  ;;  %v461_v9 = vmul.f32 0.5, %v456_v60  ;;  %v906_v12 = vsub.f32 %v456_v60, %v902_v57 }
 0x1d1   :  { %v466_v13 = vmul.f32 1.442695, %v460_v61  ;;  %v464_v14 = vmul.f32 1.442695, %v459_v63  ;;  %v503_v48 = vpop.permute.xlu0 %502 }
 0x1d2   :  { %1038 = vpow2.f32 %v462_v8  ;;  %v468_v15 = vmul.f32 1.442695, %v461_v9 }
 0x1d3   :  { %1040 = vpow2.f32 %v466_v13 }
 0x1d4   :  { %1042 = vpow2.f32 %v464_v14 }
 0x1d5   :  { %1044 = vpow2.f32 %v468_v15  ;;  %v1284_v49 = vpop.permute.xlu0 %723 }
 0x1dc   :  { %v1039_v18 = vpop.eup %1038 }
 0x1dd   :  { %v1041_v20 = vpop.eup %1040  ;;  %v470_v21 = vmul.f32 %v1039_v18, %v1039_v18  ;;  %v474_v23 = vmul.f32 %v1039_v18, %v44_v16 }
 0x1de   :  { %v1043_v24 = vpop.eup %1042  ;;  %v472_v25 = vmul.f32 %v1041_v20, %v1041_v20  ;;  %v476_v26 = vmul.f32 %v1041_v20, %v46_v17 }
 0x1df   :  { %v1045_v27 = vpop.eup %1044  ;;  %v907_v28 = vsub.f32 %v903_v59, %v470_v21  ;;  %v471_v29 = vmul.f32 %v1043_v24, %v1043_v24  ;;  %v475_v30 = vmul.f32 %v1043_v24, %v45_v19  ;;  %v478_v31 = vadd.f32 %v474_v23, %v371_v39 }
 0x1e0   :  { %v909_v32 = vsub.f32 %v905_v62, %v472_v25  ;;  %v477_v33 = vmul.f32 %v1045_v27, %v47_v22  ;;  %v480_v34 = vadd.f32 %v476_v26, %v448_v42  ;;  %v473_v35 = vmul.f32 %v1045_v27, %v1045_v27  ;;  %v483_v42 = vld [vmem:[%s1328_s6 + $0x8] sm:$0xff]  ;;  %v498_v62 = vpop.permute.xlu1 %497 }
 0x1e1   :  { %v908_v36 = vsub.f32 %v904_v3, %v471_v29  ;;  %v479_v37 = vadd.f32 %v475_v30, %v373_v43 }
 0x1e2   :  { %v481_v38 = vadd.f32 %v477_v33, %v450_v45  ;;  %v910_v41 = vsub.f32 %v906_v12, %v473_v35  ;;  %v484_v45 = vld [vmem:[%s1328_s6 + $0x10] sm:$0xff] }
 0x1e3   :  { %523 = vmatprep.subr.mxu0 %v479_v37  ;;  %v911_v44 = vadd.f32 %v908_v36, %v907_v28 }
 0x1e4   :  { %612 = vmatprep.subr.mxu1 %v481_v38  ;;  %524 = vmatpush1.msra.mxu0 %v478_v31  ;;  %v508_v36 = vpop.permute.xlu1 %507 }
 0x1e5   :  { %613 = vmatpush1.msra.mxu1 %v480_v34  ;;  %977 = vmatmul.mubr.msk.f32.vlgmr.msra.gmra.mrb[12].mxu0 %vm510_vm2, %v482_v40  ;;  %v912_v39 = vadd.f32 %v911_v44, %v909_v32 }
 0x1e6   :  { %981 = vmatmul.mubr.msk.f32.vlgmr.msra.gmra.mrb[12].mxu1 %vm510_vm2, %v482_v40  ;;  %593 = vmatprep.mubr.f32.mxu0 %v1058_v7 }
 0x1e7   :  { %682 = vmatprep.mubr.f32.mxu1 %v1058_v7  ;;  %v913_v43 = vadd.f32 %v912_v39, %v910_v41 }
 0x1e9   :  { %914 = vadd.xlane.f32.xlu0 %v913_v43  ;;  %978 = vmatmul.mubr.msk.f32.gmra.mrb[14].mxu0 %vm510_vm2, %v483_v42 }
 0x1ea   :  { %982 = vmatmul.mubr.msk.f32.gmra.mrb[14].mxu1 %vm510_vm2, %v483_v42  ;;  %599 = vmatprep.mubr.f32.mxu0 %v1058_v7 }
 0x1eb   :  { %688 = vmatprep.mubr.f32.mxu1 %v1058_v7 }
 0x1ed   :  { %979 = vmatmul.mubr.msk.f32.gmra.mrb[16].mxu0 %vm510_vm2, %v484_v45 }
 0x1ee   :  { %983 = vmatmul.mubr.msk.f32.gmra.mrb[16].mxu1 %vm510_vm2, %v484_v45  ;;  %605 = vmatprep.mubr.f32.mxu0 %v1058_v7 }
 0x1ef   :  { %694 = vmatprep.mubr.f32.mxu1 %v1058_v7 }
 0x1f1   :  { %980 = vmatmul.mubr.msk.f32.gmra.mrb[18].mxu0 %vm510_vm2, %v485_v46 }
 0x1f2   :  { %984 = vmatmul.mubr.msk.f32.gmra.mrb[18].mxu1 %vm510_vm2, %v485_v46  ;;  %801 = vmatprep.mubr.f32.mxu0 %v1058_v7 }
 0x1f3   :  { %878 = vmatprep.mubr.f32.mxu1 %v1058_v7 }
 0x276   :  { %v915_v50 = vpop.xlane.xlu0 %914 }
 0x277   :  { %v916_v51 = vrot.slane %v915_v50, 4 }
 0x279   :  { %v917_v52 = vadd.f32 %v916_v51, %v915_v50 }
 0x27b   :  { %v918_v53 = vrot.slane %v917_v52, 2 }
 0x27d   :  { %v919_v54 = vadd.f32 %v918_v53, %v917_v52 }
 0x27f   :  { %v920_v55 = vrot.slane %v919_v54, 1 }
 0x281   :  { %v921_v56 = vadd.f32 %v920_v55, %v919_v54 }
 0x283   :  { %1029 = vpush %v921_v56 }
 0x2b8   :  { %v589_v57 = vpop.f32.mrb[12].mxu0 }
 0x2b9   :  { %v678_v58 = vpop.f32.mrb[12].mxu1  ;;  %v591_v59 = vpop.f32.mrb[13].mxu0  ;;  %v590_v61 = vadd.f32 %v589_v57, %v493_v47 }
 0x2ba   :  { %v680_v60 = vpop.f32.mrb[13].mxu1  ;;  %v679_v63 = vadd.f32 %v678_v58, %v493_v47  ;;  %v592_v3 = vadd.f32 %v591_v59, %v493_v47 }
 0x2bb   :  { %v681_v9 = vadd.f32 %v680_v60, %v493_v47  ;;  %v701_v18 = vmax.f32 %v590_v61, 0.0  ;;  %v717_v61 = vld [vmem:[%s1330_s8] sm:$0xff] }
 0x2bc   :  { %v595_v8 = vpop.f32.mrb[14].mxu0  ;;  %v703_v21 = vmax.f32 %v679_v63, 0.0  ;;  %v702_v22 = vmax.f32 %v592_v3, 0.0 }
 0x2bd   :  { %v596_v12 = vadd.f32 %v595_v8, %v498_v62  ;;  %v684_v13 = vpop.f32.mrb[14].mxu1  ;;  %v597_v14 = vpop.f32.mrb[15].mxu0  ;;  %v704_v26 = vmax.f32 %v681_v9, 0.0 }
 0x2be   :  { %v685_v15 = vadd.f32 %v684_v13, %v498_v62  ;;  %v598_v16 = vadd.f32 %v597_v14, %v498_v62  ;;  %v686_v17 = vpop.f32.mrb[15].mxu1 }
 0x2bf   :  { %v705_v19 = vmax.f32 %v596_v12, 0.0  ;;  %v687_v20 = vadd.f32 %v686_v17, %v498_v62  ;;  %v718_v62 = vld [vmem:[%s1330_s8 + $0x8] sm:$0xff]  ;;  %v729_v17 = vpop.permute.xlu1 %728  ;;  %s1030_s8 = spop %1029 }
 0x2c0   :  { %v707_v23 = vmax.f32 %v685_v15, 0.0  ;;  %v706_v24 = vmax.f32 %v598_v16, 0.0  ;;  %v601_v25 = vpop.f32.mrb[16].mxu0 }
 0x2c1   :  { %v1015_v27 = vpack.c.bf16 %v705_v19, %v701_v18  ;;  %v708_v28 = vmax.f32 %v687_v20, 0.0  ;;  %v690_v29 = vpop.f32.mrb[16].mxu1  ;;  %v603_v30 = vpop.f32.mrb[17].mxu0  ;;  %v602_v35 = vadd.f32 %v601_v25, %v503_v48 }
 0x2c2   :  { %v1023_v31 = vpack.c.bf16 %v707_v23, %v703_v21  ;;  %v1013_v32 = vpack.c.bf16 %v706_v24, %v702_v22  ;;  %v692_v33 = vpop.f32.mrb[17].mxu1  ;;  %v691_v37 = vadd.f32 %v690_v29, %v503_v48  ;;  %v604_v38 = vadd.f32 %v603_v30, %v503_v48 }
 0x2c3   :  { %v1021_v34 = vpack.c.bf16 %v708_v28, %v704_v26  ;;  %v693_v41 = vadd.f32 %v692_v33, %v503_v48  ;;  %v709_v47 = vmax.f32 %v602_v35, 0.0 }
 0x2c4   :  { %v607_v40 = vpop.f32.mrb[18].mxu0  ;;  %1014 = vmatprep.subr.bf16.mxu0 %v1013_v32  ;;  %v711_v52 = vmax.f32 %v691_v37, 0.0  ;;  %v710_v53 = vmax.f32 %v604_v38, 0.0 }
 0x2c5   :  { %v608_v44 = vadd.f32 %v607_v40, %v508_v36  ;;  %v696_v39 = vpop.f32.mrb[18].mxu1  ;;  %1022 = vmatprep.subr.bf16.mxu1 %v1021_v34  ;;  %v609_v42 = vpop.f32.mrb[19].mxu0  ;;  %1016 = vmatpush1.bf16.msra.mxu0 %v1015_v27  ;;  %v712_v56 = vmax.f32 %v693_v41, 0.0 }
 0x2c6   :  { %v697_v43 = vadd.f32 %v696_v39, %v508_v36  ;;  %v610_v45 = vadd.f32 %v609_v42, %v508_v36  ;;  %v698_v46 = vpop.f32.mrb[19].mxu1  ;;  %1024 = vmatpush1.bf16.msra.mxu1 %v1023_v31 }
 0x2c7   :  { %v713_v50 = vmax.f32 %v608_v44, 0.0  ;;  %v699_v51 = vadd.f32 %v698_v46, %v508_v36 }
 0x2c8   :  { %v715_v54 = vmax.f32 %v697_v43, 0.0  ;;  %v714_v55 = vmax.f32 %v610_v45, 0.0 }
 0x2c9   :  { %v1019_v57 = vpack.c.bf16 %v713_v50, %v709_v47  ;;  %v716_v58 = vmax.f32 %v699_v51, 0.0 }
 0x2ca   :  { %v1027_v48 = vpack.c.bf16 %v715_v54, %v711_v52  ;;  %v1017_v59 = vpack.c.bf16 %v714_v55, %v710_v53 }
 0x2cb   :  { %v1025_v60 = vpack.c.bf16 %v716_v58, %v712_v56 }
 0x2cc   :  { %1018 = vmatprep.subr.bf16.mxu0 %v1017_v59 }
 0x2cd   :  { %1026 = vmatprep.subr.bf16.mxu1 %v1025_v60  ;;  %1020 = vmatpush1.bf16.msra.mxu0 %v1019_v57 }
 0x2ce   :  { %1028 = vmatpush1.bf16.msra.mxu1 %v1027_v48 }
 0x2d0   :  { %985 = vmatmul.mubr.msk.f32.vlgmr.msra.gmra.mrb[20].mxu0 %vm297_vm1, %v717_v61 }
 0x2d1   :  { %987 = vmatmul.mubr.msk.f32.vlgmr.msra.gmra.mrb[20].mxu1 %vm297_vm1, %v717_v61  ;;  %807 = vmatprep.mubr.f32.mxu0 %v1058_v7 }
 0x2d2   :  { %884 = vmatprep.mubr.f32.mxu1 %v1058_v7 }
 0x2d4   :  { %986 = vmatmul.mubr.msk.f32.gmra.mrb[22].mxu0 %vm297_vm1, %v718_v62 }
 0x2d5   :  { %988 = vmatmul.mubr.msk.f32.gmra.mrb[22].mxu1 %vm297_vm1, %v718_v62 }
 0x3a3   :  { %v803_v63 = vpop.f32.mrb[20].mxu0 }
 0x3a4   :  { %v804_v3 = vadd.f32 %v803_v63, %v1284_v49  ;;  %v880_v8 = vpop.f32.mrb[20].mxu1  ;;  %v805_v9 = vpop.f32.mrb[21].mxu0 }
 0x3a5   :  { %v881_v12 = vadd.f32 %v880_v8, %v1284_v49  ;;  %v806_v13 = vadd.f32 %v805_v9, %v1284_v49  ;;  %v882_v14 = vpop.f32.mrb[21].mxu1 }
 0x3a6   :  { %v891_v15 = vsub.f32 %v1141_v5, %v804_v3  ;;  %v883_v16 = vadd.f32 %v882_v14, %v1284_v49 }
 0x3a7   :  { %v893_v7 = vsub.f32 %v1157_v10, %v881_v12  ;;  %v892_v18 = vsub.f32 %v1119_v0, %v806_v13  ;;  %v809_v19 = vpop.f32.mrb[22].mxu0 }
 0x3a8   :  { %v923_v20 = vmul.f32 %v891_v15, %v891_v15  ;;  %v810_v21 = vadd.f32 %v809_v19, %v729_v17  ;;  %v886_v22 = vpop.f32.mrb[22].mxu1  ;;  %v811_v23 = vpop.f32.mrb[23].mxu0  ;;  %v894_v25 = vsub.f32 %v1129_v2, %v883_v16 }
 0x3a9   :  { %v924_v24 = vmul.f32 %v892_v18, %v892_v18  ;;  %v812_v26 = vadd.f32 %v811_v23, %v729_v17  ;;  %v888_v27 = vpop.f32.mrb[23].mxu1  ;;  %v925_v28 = vmul.f32 %v893_v7, %v893_v7  ;;  %v887_v49 = vadd.f32 %v886_v22, %v729_v17 }
 0x3aa   :  { %v895_v5 = vsub.f32 %v1146_v6, %v810_v21  ;;  %v926_v30 = vmul.f32 %v894_v25, %v894_v25  ;;  %v889_v0 = vadd.f32 %v888_v27, %v729_v17 }
 0x3ab   :  { %v931_v29 = vadd.f32 %v924_v24, %v923_v20  ;;  %v896_v10 = vsub.f32 %v1124_v1, %v812_v26  ;;  %v897_v34 = vsub.f32 %v1162_v11, %v887_v49 }
 0x3ac   :  { %v927_v33 = vmul.f32 %v895_v5, %v895_v5  ;;  %v898_v2 = vsub.f32 %v1136_v4, %v889_v0 }
 0x3ad   :  { %v932_v31 = vadd.f32 %v931_v29, %v925_v28  ;;  %v928_v36 = vmul.f32 %v896_v10, %v896_v10  ;;  %v929_v37 = vmul.f32 %v897_v34, %v897_v34 }
 0x3ae   :  { %v930_v40 = vmul.f32 %v898_v2, %v898_v2 }
 0x3af   :  { %v933_v32 = vadd.f32 %v932_v31, %v926_v30 }
 0x3b1   :  { %v934_v35 = vadd.f32 %v933_v32, %v927_v33 }
 0x3b3   :  { %v935_v38 = vadd.f32 %v934_v35, %v928_v36 }
 0x3b5   :  { %v936_v41 = vadd.f32 %v935_v38, %v929_v37 }
 0x3b7   :  { %v937_v44 = vadd.f32 %v936_v41, %v930_v40 }
 0x3b9   :  { %938 = vadd.xlane.f32.xlu1 %v937_v44 }
 0x446   :  { %v939_v6 = vpop.xlane.xlu1 %938 }
 0x447   :  { %v940_v39 = vrot.slane %v939_v6, 4 }
 0x449   :  { %v941_v42 = vadd.f32 %v940_v39, %v939_v6 }
 0x44b   :  { %v942_v43 = vrot.slane %v941_v42, 2 }
 0x44d   :  { %v943_v1 = vadd.f32 %v942_v43, %v941_v42 }
 0x44f   :  { %v944_v45 = vrot.slane %v943_v1, 1 }
 0x451   :  { %v945_v46 = vadd.f32 %v944_v45, %v943_v1 }
 0x453   :  { %1031 = vpush %v945_v46 }
 0x484   :  { %s1032_s0 = spop %1031 }
 0x485   :  { %s947_s2 = ssub.f32 %s1030_s8, %s1032_s0 }
 0x487   :  { %s948_s13 = smul.f32 0.5, %s947_s2 }
 0x489   :  { %s949_s14 = sadd.f32 -5479.9443, %s948_s13 }
 0x48b   :  { %951 = sst [smem:[#allocation2]] %s949_s14 }
 0x48c   :  { %1055 = shalt.err (!%p1052_p2)
}
 0x48d   :  { %s1060_s19 = smov [#allocation2]  }
 0x48e   :  { %959 = dma.smem_to_hbm %s1060_s19, 16, %s1332_s10, [#allocation3]  }
 0x48f   :  { %1056 = dma.done.wait [#allocation3], 16  }
 0x490   :  { %1057 = vsyncadd [#allocation3], 4294967280 }
 0x491   :  { %963 = sfence }
 0x492   :  { %964 = vsyncpa [#allocation3], 1 }

</bundles_post_ra>
